<compile_context>
chip_gen: v5e
topology: v5e:2x2
jax: 0.10.0
libtpu: 0.0.40
codegen_flags: <defaults>
</compile_context>

<pallas_src>
import jax
import jax.numpy as jnp
from jax.experimental import pallas as pl
from jax.experimental.pallas import tpu as pltpu


def _vmem_budget_bytes():
    """~3/4 of per-core VMEM; generation-aware when queryable, v7x-safe fallback."""
    cap = 64 * 1024 * 1024  # v7x per-TensorCore VMEM (smallest current part)
    try:
        cap = int(pltpu.get_tpu_info().vmem_capacity_bytes)
    except Exception:
        pass
    return (cap * 3) // 4


def _choose_tiles(B, L, D, itemsize, budget_bytes):
    """Pick (TB, TL) so that everything resident in VMEM fits the budget."""
    row_bytes = D * itemsize
    sub = 16 if itemsize == 2 else 8  # sublane multiple (packed for bf16)

    def fits(tb, tl):
        in_bytes = 2 * 2 * tb * tl * row_bytes   # 2 inputs x double-buffered tiles
        acc_bytes = tb * D * 4                   # f32 accumulator scratch
        return in_bytes + acc_bytes <= budget_bytes

    # TL: largest divisor of L that respects the sublane multiple (or L itself).
    tl_cands = sorted({t for t in range(sub, L, sub) if L % t == 0} | {L},
                      reverse=True)
    tl = next((t for t in tl_cands if fits(1, t)), tl_cands[-1])

    # TB: largest tile that fits; prefer an exact divisor of B (no padding)
    # unless that would force a much smaller tile.
    tb_fit = 1
    for t in range(1, B + 1):
        if fits(t, tl):
            tb_fit = t
    tb_div = max((t for t in range(1, tb_fit + 1) if B % t == 0), default=1)
    tb = tb_div if 2 * tb_div >= tb_fit else tb_fit
    return tb, tl


def topk_mse_loss(output, label, topk: int, *, tile_b=None, tile_l=None):
    """Pallas equivalent of TopkMSELoss(topk)(output, label). Returns (topk,) f32."""
    assert output.shape == label.shape and output.ndim == 3
    B, L, D = output.shape
    assert 1 <= topk <= B, "torch.topk requires k <= batch size"

    itemsize = int(jnp.dtype(output.dtype).itemsize)
    sub = 16 if itemsize == 2 else 8
    budget = _vmem_budget_bytes()
    tb_auto, tl_auto = _choose_tiles(B, L, D, itemsize, budget)
    TB = int(tile_b) if tile_b is not None else tb_auto
    TL = int(tile_l) if tile_l is not None else tl_auto
    assert L % TL == 0, "L tiles must cover L exactly"
    assert TL == L or TL % sub == 0, "partial-L tiles must respect the sublane multiple"

    # Pad B up to a multiple of TB; padded samples are dropped before top_k.
    nb = -(-B // TB)
    Bp = nb * TB
    if Bp != B:
        pad = ((0, Bp - B), (0, 0), (0, 0))
        output = jnp.pad(output, pad)
        label = jnp.pad(label, pad)
    nl = L // TL
    inv_n = 1.0 / float(L * D)  # Python float -> literal, never a captured jax const

    def kernel(pred_ref, label_ref, losses_ref, acc_ref):
        # pred_ref / label_ref: (TB, TL, D) input tiles in VMEM
        # losses_ref:           (1, 1, TB) per-batch-tile output block
        # acc_ref:              (TB, D) f32 per-tile accumulator scratch
        l = pl.program_id(1)
        d = pred_ref[...].astype(jnp.float32) - label_ref[...].astype(jnp.float32)
        # Sublane reduction over the L-chunk only; features stay in lanes.
        partial = jnp.sum(d * d, axis=1)                      # (TB, D)

        @pl.when(l == 0)
        def _first():                                         # init merged w/ 1st add
            acc_ref[...] = partial

        @pl.when(l != 0)
        def _rest():
            acc_ref[...] += partial

        @pl.when(l == pl.num_programs(1) - 1)
        def _finalize():                                      # once per batch tile
            losses_ref[...] = (jnp.sum(acc_ref[...], axis=1) * inv_n
                               ).reshape(1, 1, TB)

    # VMEM actually used; set the scoped limit from it (with headroom).
    used_bytes = (2 * 2 * TB * TL * D * itemsize   # inputs, double-buffered
                  + TB * D * 4                     # accumulator scratch
                  + 2 * TB * 4)                    # tiny output block buffers
    vmem_limit = int(max(used_bytes + (8 << 20), 32 << 20))

    grid_spec = pltpu.PrefetchScalarGridSpec(
        num_scalar_prefetch=0,
        grid=(nb, nl),                                   # reduction (L) axis last
        in_specs=[
            pl.BlockSpec((TB, TL, D), lambda b, l: (b, l, 0)),
            pl.BlockSpec((TB, TL, D), lambda b, l: (b, l, 0)),
        ],
        out_specs=pl.BlockSpec((1, 1, TB), lambda b, l: (b, 0, 0)),
        scratch_shapes=[pltpu.VMEM((TB, D), jnp.float32)],
    )

    losses = pl.pallas_call(
        kernel,
        out_shape=jax.ShapeDtypeStruct((nb, 1, TB), jnp.float32),
        grid_spec=grid_spec,
        compiler_params=pltpu.CompilerParams(
            # Batch tiles are independent now -> megacore-shard them (v7x);
            # the L (reduction) axis stays sequential.
            dimension_semantics=("parallel", "arbitrary"),
            vmem_limit_bytes=vmem_limit,
        ),
        cost_estimate=pl.CostEstimate(
            flops=3 * Bp * L * D,
            transcendentals=0,
            bytes_accessed=2 * Bp * L * D * itemsize + 4 * Bp,
        ),
    )(output, label)

    losses = losses.reshape(Bp)[:B]
    # Tiny (B,) top-k outside the kernel: matches torch.topk (descending values).
    return jax.lax.top_k(losses, topk)[0]


def _reference(output, label, topk: int):
    losses = jnp.mean(jnp.mean((output.astype(jnp.float32)
                                - label.astype(jnp.float32)) ** 2, axis=2), axis=1)
    return jax.lax.top_k(losses, topk)[0]


if __name__ == "__main__":
    key = jax.random.PRNGKey(0)
    k1, k2, k3, k4 = jax.random.split(key, 4)

    # Main check: force a multi-step grid (2 batch tiles x 4 L chunks) so the
    # accumulate / finalize / parallel-batch paths are all exercised.
    B, L, D, TOPK = 8, 64, 128, 4
    output = jax.random.normal(k1, (B, L, D), dtype=jnp.float32)
    label = jax.random.normal(k2, (B, L, D), dtype=jnp.float32)
    got = jax.block_until_ready(topk_mse_loss(output, label, TOPK, tile_b=4, tile_l=16))
    want = _reference(output, label, TOPK)
    assert got.shape == (TOPK,)
    assert jnp.allclose(got, want, atol=1e-5, rtol=1e-5), (got, want)

    # Secondary check: B not divisible by the batch tile (padding path).
    B2, K2 = 6, 3
    out2 = jax.random.normal(k3, (B2, L, D), dtype=jnp.float32)
    lab2 = jax.random.normal(k4, (B2, L, D), dtype=jnp.float32)
    got2 = jax.block_until_ready(topk_mse_loss(out2, lab2, K2, tile_b=4, tile_l=32))
    want2 = _reference(out2, lab2, K2)
    assert jnp.allclose(got2, want2, atol=1e-5, rtol=1e-5), (got2, want2)

    print("KERNEL_OK")
</pallas_src>

<mosaic_0001>
module attributes {stable_mosaic.version = 11 : i64} {
  func.func @kernel(%arg0: i32, %arg1: i32, %arg2: memref<4x16x128xf32, #tpu.memory_space<vmem>>, %arg3: memref<4x16x128xf32, #tpu.memory_space<vmem>>, %arg4: memref<1x1x4xf32, #tpu.memory_space<vmem>>, %arg5: memref<4x128xf32, #tpu.memory_space<vmem>>) attributes {dimension_semantics = [#tpu.dimension_semantics<parallel>, #tpu.dimension_semantics<arbitrary>], iteration_bounds = array<i64: 2, 4>, scalar_prefetch = 0 : i64, scratch_operands = 1 : i64, tpu.core_type = #tpu.core_type<tc>, window_params = [{transform_indices = @transform_0, window_bounds = array<i64: 4, 16, 128>}, {transform_indices = @transform_1, window_bounds = array<i64: 4, 16, 128>}, {transform_indices = @transform_2, window_bounds = array<i64: 1, 1, 4>}]} {
    %c0 = arith.constant 0 : index
    %c0_0 = arith.constant 0 : index
    %c0_1 = arith.constant 0 : index
    %0 = vector.load %arg2[%c0, %c0_0, %c0_1] : memref<4x16x128xf32, #tpu.memory_space<vmem>>, vector<4x16x128xf32>
    %c0_2 = arith.constant 0 : index
    %c0_3 = arith.constant 0 : index
    %c0_4 = arith.constant 0 : index
    %1 = vector.load %arg3[%c0_2, %c0_3, %c0_4] : memref<4x16x128xf32, #tpu.memory_space<vmem>>, vector<4x16x128xf32>
    %2 = arith.subf %0, %1 : vector<4x16x128xf32>
    %3 = arith.mulf %2, %2 : vector<4x16x128xf32>
    %cst = arith.constant dense<0.000000e+00> : vector<4x128xf32>
    %4 = vector.multi_reduction <add>, %3, %cst [1] : vector<4x16x128xf32> to vector<4x128xf32>
    %c0_i32 = arith.constant 0 : i32
    %5 = arith.cmpi eq, %arg1, %c0_i32 : i32
    %6 = arith.extui %5 : i1 to i32
    %c0_i32_5 = arith.constant 0 : i32
    %7 = arith.cmpi ne, %6, %c0_i32_5 : i32
    scf.if %7 {
      %c0_9 = arith.constant 0 : index
      %c0_10 = arith.constant 0 : index
      %14 = vector.load %arg5[%c0_9, %c0_10] : memref<4x128xf32, #tpu.memory_space<vmem>>, vector<4x128xf32>
      tpu.vector_store %arg5[%c0_9, %c0_10], %4 {strides = array<i32>} : memref<4x128xf32, #tpu.memory_space<vmem>>, vector<4x128xf32>,
    } else {
    }
    %c0_i32_6 = arith.constant 0 : i32
    %8 = arith.cmpi ne, %arg1, %c0_i32_6 : i32
    %9 = arith.extui %8 : i1 to i32
    %c0_i32_7 = arith.constant 0 : i32
    %10 = arith.cmpi ne, %9, %c0_i32_7 : i32
    scf.if %10 {
      %c0_9 = arith.constant 0 : index
      %c0_10 = arith.constant 0 : index
      %14 = vector.load %arg5[%c0_9, %c0_10] : memref<4x128xf32, #tpu.memory_space<vmem>>, vector<4x128xf32>
      %15 = arith.addf %14, %4 : vector<4x128xf32>
      %c0_11 = arith.constant 0 : index
      %c0_12 = arith.constant 0 : index
      %16 = vector.load %arg5[%c0_11, %c0_12] : memref<4x128xf32, #tpu.memory_space<vmem>>, vector<4x128xf32>
      tpu.vector_store %arg5[%c0_11, %c0_12], %15 {strides = array<i32>} : memref<4x128xf32, #tpu.memory_space<vmem>>, vector<4x128xf32>,
    } else {
    }
    %c3_i32 = arith.constant 3 : i32
    %11 = arith.cmpi eq, %arg1, %c3_i32 : i32
    %12 = arith.extui %11 : i1 to i32
    %c0_i32_8 = arith.constant 0 : i32
    %13 = arith.cmpi ne, %12, %c0_i32_8 : i32
    scf.if %13 {
      %c0_9 = arith.constant 0 : index
      %c0_10 = arith.constant 0 : index
      %14 = vector.load %arg5[%c0_9, %c0_10] : memref<4x128xf32, #tpu.memory_space<vmem>>, vector<4x128xf32>
      %cst_11 = arith.constant dense<0.000000e+00> : vector<4xf32>
      %15 = vector.multi_reduction <add>, %14, %cst_11 [1] : vector<4x128xf32> to vector<4xf32>
      %cst_12 = arith.constant 1.22070313E-4 : f32
      %16 = vector.broadcast %cst_12 : f32 to vector<4xf32>
      %17 = arith.mulf %15, %16 : vector<4xf32>
      %18 = vector.shape_cast %17 : vector<4xf32> to vector<1x1x4xf32>
      %c0_13 = arith.constant 0 : index
      %c0_14 = arith.constant 0 : index
      %c0_15 = arith.constant 0 : index
      %19 = vector.load %arg4[%c0_13, %c0_14, %c0_15] : memref<1x1x4xf32, #tpu.memory_space<vmem>>, vector<1x1x4xf32>
      tpu.vector_store %arg4[%c0_13, %c0_14, %c0_15], %18 {strides = array<i32>} : memref<1x1x4xf32, #tpu.memory_space<vmem>>, vector<1x1x4xf32>,
    } else {
    }
    return
  }
  func.func @transform_0(%arg0: i32, %arg1: i32) -> (i32, i32, i32) {
    %c0_i32 = arith.constant 0 : i32
    %c0_i32_0 = arith.constant 0 : i32
    return %arg0, %arg1, %c0_i32 : i32, i32, i32
  }
  func.func @transform_1(%arg0: i32, %arg1: i32) -> (i32, i32, i32) {
    %c0_i32 = arith.constant 0 : i32
    %c0_i32_0 = arith.constant 0 : i32
    return %arg0, %arg1, %c0_i32 : i32, i32, i32
  }
  func.func @transform_2(%arg0: i32, %arg1: i32) -> (i32, i32, i32) {
    %c0_i32 = arith.constant 0 : i32
    %c0_i32_0 = arith.constant 0 : i32
    %c0_i32_1 = arith.constant 0 : i32
    return %arg0, %c0_i32, %c0_i32_0 : i32, i32, i32
  }
}

</mosaic_0001>

<bundles_post_ra>
// kernel: tpu_custom_call.1
= control target key start
LH: loop header
LB: loop body
LE: loop exit
PB: predicated region body
PF: predicated region fallthrough
CT: control target
= control target key end

     0   :  { %s1045_s0 = inlined_call_operand.hbm [shape: f32[8,64,128], index: 0, kind: input, shape index: {}]   ;;  %s1046_s1 = inlined_call_operand.hbm [shape: f32[8,64,128], index: 1, kind: input, shape index: {}]   ;;  %s1047_s2 = inlined_call_operand.hbm [shape: f32[2,1,4], index: 2, kind: output, shape index: {}]  }
   0x1   :  { %1053 = sst [smem:[#allocation22_spill]] %s1045_s0 }
   0x2   :  { %7 = vsyncpa [#allocation4], 0 }
   0x3   :  { %9 = vsyncpa [#allocation4 + $0x1], 0 }
   0x4   :  { %10 = vsyncpa [#allocation7], 0 }
   0x5   :  { %12 = vsyncpa [#allocation7 + $0x1], 0 }
   0x6   :  { %13 = vsyncpa [#allocation5], 0 }
   0x7   :  { %15 = vsyncpa [#allocation5 + $0x1], 0  ;;  %s819_s9 = smov 0   ;;  %s821_s10 = smov 0  }
   0x8   :  { %s823_s11 = smov 0   ;;  %s825_s12 = smov 0  }
   0x9   :  { %s827_s13 = smov 0   ;;  %s829_s14 = smov 0  }
   0xa   :  { %s831_s15 = smov 0   ;;  %s833_s16 = smov 0  }
   0xb   :  { %s835_s17 = smov 0   ;;  %s837_s18 = smov 0  }
   0xc   :  { %s839_s19 = smov 0  }
   0xd LB: > { %1054 = sst [smem:[#allocation18_spill]] %s782_s17  ;;  %s511_s20 = sadd.s32 4294967295, %s790_s19   ;;  %s790_s19 = sphi %s839_s19, %s21_s19   ;;  %s786_s18 = sphi %s837_s18, %s1067_s18   ;;  %s782_s17 = sphi %s835_s17, %s1066_s17   ;;  %s778_s16 = sphi %s833_s16, %s1065_s16   ;;  %s774_s15 = sphi %s831_s15, %s1064_s15   ;;  %s770_s14 = sphi %s829_s14, %s1073_s14   ;;  %s766_s13 = sphi %s827_s13, %s1072_s13   ;;  %s762_s12 = sphi %s825_s12, %s1071_s12   ;;  %s758_s11 = sphi %s823_s11, %s1070_s11   ;;  %s754_s10 = sphi %s821_s10, %s1069_s10   ;;  %s750_s9 = sphi %s819_s9, %s1068_s9  }
   0xe   : > { %1055 = sst [smem:[#allocation19_spill]] %s786_s18  ;;  %s512_s21 = sadd.s32 4294967294, %s790_s19  }
   0xf   : > { %s30_s22 = sadd.s32 1, %s782_s17  ;;  %s33_s23 = sadd.s32 1, %s786_s18 }
  0x10   : > { %p31_p0 = scmp.ge.s32.totalorder %s30_s22, 4  ;;  %s42_s24 = sadd.s32 1, %s770_s14 }
  0x11   : > { %p49_p1 = scmp.ne.s32.totalorder %s770_s14, %s766_s13  ;;  %p50_p2 = scmp.eq.s32.totalorder %s790_s19, 0 }
  0x12   : > { %s1075_s22 = smov (%p31_p0, %s30_s22), 0  ;;  %s1077_s23 = smov (!%p31_p0, %s33_s23), %s786_s18 }
  0x13   : > { %1056 = sst [smem:[#allocation20_spill]] %s1075_s22  ;;  %s38_s25 = ssub.s32 %s782_s17, %s1075_s22 }
  0x14   : > { %p885_p3 = por %p50_p2, %p49_p1  ;;  %p35_p4 = scmp.ge.s32.totalorder %s1077_s23, 2 }
  0x15   : > { %p55_p5 = scmp.ne.s32.totalorder %s766_s13, %s762_s12  ;;  %p56_p6 = scmp.eq.s32.totalorder %s511_s20, 0 }
  0x16   : > { %s96_s27 = sadd.s32 1, %s758_s11  ;;  %s1079_s23 = smov (%p35_p4, %s1077_s23), 0 }
  0x17   : > { %1058 = sst [smem:[#allocation21_spill]] %s1079_s23  ;;  %p893_p7 = por %p56_p6, %p55_p5 }
  0x18   : > { %p106_p8 = scmp.ne.s32.totalorder %s758_s11, %s754_s10  ;;  %s37_s29 = ssub.s32 %s786_s18, %s1079_s23 }
  0x19   : > { %p107_p9 = scmp.eq.s32.totalorder %s511_s20, 7  ;;  %s39_s30 = sor.u32 %s38_s25, %s37_s29 }
  0x1a   : > { %p94_p10 = scmp.eq.s32.totalorder %s37_s29, 0  ;;  %p40_p11 = scmp.eq.s32.totalorder %s39_s30, 0 }
  0x1b   : > { %p901_p12 = por %p107_p9, %p106_p8  ;;  %p112_p13 = scmp.ne.s32.totalorder %s754_s10, %s750_s9 }
  0x1c   : > { %s906_s4 = scalar_select %p94_p10, %s758_s11, %s96_s27  }
  0x1d   : > { %s909_s5 = scalar_select %p40_p11, %s770_s14, %s42_s24  }
  0x1e   : > { %p113_p0 = scmp.eq.s32.totalorder %s512_s21, 7  ;;  %p514_p2 = scmp.ge.s32.totalorder %s790_s19, 8 }
  0x20   : > { %p913_p1 = por %p113_p0, %p112_p13  ;;  %129 = sbr.rel (%p514_p2) target bundleno = 67 (0x43), region = 16 }
  0x25   : > { %s919_s7 = sand.u32 1, %s770_s14   ;;  %s517_s8 = sshll.u32 %s782_s17, 1 }
  0x26   : > { %s1051_s12 = sshll.u32 %s919_s7, 6  ;;  %s537_s20 = sshll.u32 %s786_s18, 5 }
  0x27   : > { %s924_s21 = sadd.s32 %s537_s20, %s517_s8  ;;  %s137_s25 = scalar_lea.vmem [#allocation3], %s1051_s12 }
  0x28   : > { %s519_s24 = sshll.u32 %s924_s21, 3  ;;  %s160_s27 = sshll.u32 %s137_s25, 4  ;;  %s161_s27 = int_to_ptr.vmem [resolvable:$true] %s160_s27 }
  0x29   : > { %s1062_s0 = sld [smem:[#allocation22_spill]]  ;;  %s792_s17 = smov 1024  }
  0x2a   : > { %s539_s22 = scalar_select %p885_p3, [#allocation0], [#allocation13] }
  0x2b   : > { %540 = sst [smem:[#allocation10]] (%p885_p3), %s792_s17  ;;  %s793_s21 = smov 256  }
  0x2c   : > { %s150_s8 = sld [smem:[%s539_s22]]   ;;  %s794_s12 = smov 2  }
  0x2d   : > { %541 = sst [smem:[#allocation10 + $0x1]] (%p885_p3), %s793_s21  ;;  %s795_s25 = smov 128  }
  0x2e   : > { %542 = sst [smem:[#allocation10 + $0x2]] (%p885_p3), %s794_s12  ;;  %s796_s30 = smov 8  }
  0x2f   : > { %s145_s23 = scalar_lea.hbm %s1062_s0, %s519_s24  ;;  %543 = sst [smem:[#allocation10 + $0x3]] (%p885_p3), %s795_s25 }
  0x30   : > { %s158_s20 = sshll.u32 %s145_s23, 4  ;;  %544 = sst [smem:[#allocation10 + $0x4]] (%p885_p3), %s795_s25  ;;  %s159_s20 = int_to_ptr.hbm [resolvable:$true] %s158_s20 }
  0x31   : > { %545 = sst [smem:[#allocation10 + $0x5]] (%p885_p3), %s796_s30  ;;  %s134_s22 = scalar_lea.sflag [#allocation4], %s919_s7 }
  0x32   : > { %s520_s29 = sshll.u32 %s150_s8, 26  ;;  %s797_s0 = smov [#allocation9]  }
  0x33   : > { %s521_s17 = sadd.s32 134217728, %s520_s29 }
  0x34   : > { %546 = dma.general (%p885_p3), %s159_s20, 1024, %s161_s27, %s134_s22, %s797_s0, [#allocation10], %s521_s17, 0  }
  0x35   : > { %s195_s12 = scalar_lea.hbm %s1046_s1, %s519_s24  ;;  %s1063_s25 = sshll.u32 %s919_s7, 6 }
  0x36   : > { %s187_s8 = scalar_lea.vmem [#allocation6], %s1063_s25  ;;  %s208_s30 = sshll.u32 %s195_s12, 4  ;;  %s209_s30 = int_to_ptr.hbm [resolvable:$true] %s208_s30 }
  0x37   : > { %s210_s18 = sshll.u32 %s187_s8, 4  ;;  %s798_s27 = smov 1024   ;;  %s211_s18 = int_to_ptr.vmem [resolvable:$true] %s210_s18 }
  0x38   : > { %s547_s29 = scalar_select %p885_p3, [#allocation0], [#allocation14] }
  0x39   : > { %548 = sst [smem:[#allocation12]] (%p885_p3), %s798_s27  ;;  %s799_s20 = smov 256  }
  0x3a   : > { %s200_s0 = sld [smem:[%s547_s29]]   ;;  %s800_s24 = smov 2  }
  0x3b   : > { %549 = sst [smem:[#allocation12 + $0x1]] (%p885_p3), %s799_s20  ;;  %s801_s17 = smov 128  }
  0x3c   : > { %550 = sst [smem:[#allocation12 + $0x2]] (%p885_p3), %s800_s24  ;;  %s802_s21 = smov 8  }
  0x3d   : > { %551 = sst [smem:[#allocation12 + $0x3]] (%p885_p3), %s801_s17  ;;  %s184_s12 = scalar_lea.sflag [#allocation7], %s919_s7 }
  0x3e   : > { %552 = sst [smem:[#allocation12 + $0x4]] (%p885_p3), %s801_s17  ;;  %s803_s25 = smov [#allocation11]  }
  0x3f   : > { %553 = sst [smem:[#allocation12 + $0x5]] (%p885_p3), %s802_s21 }
  0x40   : > { %s527_s22 = sshll.u32 %s200_s0, 26 }
  0x41   : > { %s528_s23 = sadd.s32 134217728, %s527_s22 }
  0x42   : > { %554 = dma.general (%p885_p3), %s209_s30, 1024, %s211_s18, %s184_s12, %s803_s25, [#allocation12], %s528_s23, 0  }
  0x43 PF: > { %p529_p4 = scmp.ge.s32.totalorder %s790_s19, 1  ;;  %p231_p5 = scmp.lt.s32.totalorder %s790_s19, 9 }
  0x45   : > { %p232_p6 = pnand %p529_p4, %p231_p5 }
  0x46   : > { %s237_s8 = sand.u32 (!%p232_p6), 1, %s766_s13  }
  0x47   : > { %235 = sbr.rel (%p232_p6) target bundleno = 265 (0x109), region = 28  ;;  %s530_s29 = sshll.u32 (!%p232_p6), %s237_s8, 6 }
  0x48   : > { %s238_s0 = scalar_lea.sflag (!%p232_p6), [#allocation4], %s237_s8  ;;  %s241_s27 = scalar_lea.vmem (!%p232_p6), [#allocation3], %s530_s29 }
  0x4c   : > { %737 = dma.done.wait (%p893_p7), %s238_s0, 1024  }
  0x4d   : > { %739 = vsyncadd (%p893_p7), %s238_s0, 4294966272  ;;  %s248_s18 = scalar_lea.sflag [#allocation7], %s237_s8  ;;  %s251_s26 = scalar_lea.vmem [#allocation6], %s530_s29 }
  0x4e   : > { %741 = dma.done.wait (%p893_p7), %s248_s18, 1024  }
  0x4f   : > { %743 = vsyncadd (%p893_p7), %s248_s18, 4294966272  ;;  %s275_s7 = sand.u32 1, %s754_s10   ;;  %v281_v0 = vld [vmem:[%s241_s27] sm:$0xff]  ;;  %v282_v1 = vld [vmem:[%s241_s27 + $0x8] sm:$0xff]  ;;  %p532_p3 = scmp.ne.s32.totalorder %s774_s15, 0 }
  0x50   : > { %v283_v2 = vld [vmem:[%s241_s27 + $0x10] sm:$0xff]  ;;  %v284_v3 = vld [vmem:[%s241_s27 + $0x18] sm:$0xff]  ;;  %v285_v4 = vld [vmem:[%s241_s27 + $0x20] sm:$0xff]  ;;  %s985_s28 = scalar_lea.vmem [#allocation8], %s275_s7 }
  0x51   : > { %v286_v5 = vld [vmem:[%s241_s27 + $0x28] sm:$0xff]  ;;  %v287_v6 = vld [vmem:[%s241_s27 + $0x30] sm:$0xff]  ;;  %v288_v7 = vld [vmem:[%s241_s27 + $0x38] sm:$0xff] }
  0x52   : > { %v289_v8 = vld [vmem:[%s251_s26] sm:$0xff]  ;;  %v290_v9 = vld [vmem:[%s251_s26 + $0x8] sm:$0xff]  ;;  %v291_v10 = vld [vmem:[%s251_s26 + $0x10] sm:$0xff] }
  0x53   : > { %v292_v11 = vld [vmem:[%s251_s26 + $0x18] sm:$0xff]  ;;  %v297_v12 = vsub.f32 %v281_v0, %v289_v8  ;;  %v293_v13 = vld [vmem:[%s251_s26 + $0x20] sm:$0xff]  ;;  %v294_v14 = vld [vmem:[%s251_s26 + $0x28] sm:$0xff]  ;;  %v298_v16 = vsub.f32 %v282_v1, %v290_v9  ;;  %v299_v17 = vsub.f32 %v283_v2, %v291_v10 }
  0x54   : > { %v295_v15 = vld [vmem:[%s251_s26 + $0x30] sm:$0xff]  ;;  %v300_v18 = vsub.f32 %v284_v3, %v292_v11  ;;  %v296_v19 = vld [vmem:[%s251_s26 + $0x38] sm:$0xff]  ;;  %v301_v20 = vsub.f32 %v285_v4, %v293_v13  ;;  %v302_v21 = vsub.f32 %v286_v5, %v294_v14 }
  0x55   : > { %v303_v22 = vsub.f32 %v287_v6, %v295_v15  ;;  %v305_v23 = vmul.f32 %v297_v12, %v297_v12  ;;  %v304_v24 = vsub.f32 %v288_v7, %v296_v19  ;;  %v306_v25 = vmul.f32 %v298_v16, %v298_v16 }
  0x56   : > { %v307_v26 = vmul.f32 %v299_v17, %v299_v17  ;;  %v308_v27 = vmul.f32 %v300_v18, %v300_v18  ;;  %v309_v28 = vmul.f32 %v301_v20, %v301_v20  ;;  %v310_v29 = vmul.f32 %v302_v21, %v302_v21 }
  0x57   : > { %v311_v30 = vmul.f32 %v303_v22, %v303_v22  ;;  %v312_v31 = vmul.f32 %v304_v24, %v304_v24  ;;  %v313_v32 = vadd.f32 %v306_v25, %v305_v23 }
  0x58   : > { %v320_v33 = vadd.f32 %v308_v27, %v307_v26  ;;  %v327_v34 = vadd.f32 %v310_v29, %v309_v28 }
  0x59   : > { %v314_v35 = vrot.slane %v313_v32, 4  ;;  %v334_v37 = vadd.f32 %v312_v31, %v311_v30 }
  0x5a   : > { %v321_v36 = vrot.slane %v320_v33, 4  ;;  %v328_v38 = vrot.slane %v327_v34, 4 }
  0x5b   : > { %v315_v39 = vadd.f32 %v314_v35, %v313_v32  ;;  %v335_v41 = vrot.slane %v334_v37, 4 }
  0x5c   : > { %v322_v40 = vadd.f32 %v321_v36, %v320_v33  ;;  %v329_v42 = vadd.f32 %v328_v38, %v327_v34 }
  0x5d   : > { %v316_v43 = vrot.slane %v315_v39, 2  ;;  %v336_v45 = vadd.f32 %v335_v41, %v334_v37 }
  0x5e   : > { %v323_v44 = vrot.slane %v322_v40, 2  ;;  %v330_v46 = vrot.slane %v329_v42, 2 }
  0x5f   : > { %v317_v47 = vadd.f32 %v316_v43, %v315_v39  ;;  %v337_v49 = vrot.slane %v336_v45, 2 }
  0x60   : > { %v324_v48 = vadd.f32 %v323_v44, %v322_v40  ;;  %v331_v50 = vadd.f32 %v330_v46, %v329_v42 }
  0x61   : > { %v318_v51 = vrot.slane %v317_v47, 1  ;;  %v338_v53 = vadd.f32 %v337_v49, %v336_v45  ;;  %344 = sbr.rel (%p532_p3) target bundleno = 107 (0x6b), region = 40 }
  0x62   : > { %v325_v52 = vrot.slane %v324_v48, 1  ;;  %v332_v54 = vrot.slane %v331_v50, 1 }
  0x63   : > { %v319_v55 = vadd.f32 %v318_v51, %v317_v47  ;;  %v339_v57 = vrot.slane %v338_v53, 1 }
  0x64   : > { %v326_v56 = vadd.f32 %v325_v52, %v324_v48  ;;  %v333_v58 = vadd.f32 %v332_v54, %v331_v50 }
  0x65   : > { %v340_v59 = vadd.f32 %v339_v57, %v338_v53 }
  0x66   : > { %vm349_vm0 = vcmask 1041409   ;;  %vm351_vm1 = vcmask 1042434   ;;  %vm353_vm2 = vcmask 1043459  }
  0x67   : > { %v350_v60 = vsel %vm349_vm0, %v326_v56, %v319_v55 }
  0x68   : > { %v352_v61 = vsel %vm351_vm1, %v333_v58, %v350_v60 }
  0x69   : > { %v354_v62 = vsel %vm353_vm2, %v340_v59, %v352_v61 }
  0x6a   : > { %356 = vst [vmem:[#allocation2] sm:$0xf] %v354_v62 }
  0x6b PF: > { %p533_p7 = scmp.eq.s32.totalorder %s774_s15, 0 }
  0x6d   : > { %360 = sbr.rel (%p533_p7) target bundleno = 121 (0x79), region = 44 }
  0x72   : > { %vm366_vm3 = vcmask 1041409   ;;  %vm368_vm4 = vcmask 1042434   ;;  %vm370_vm5 = vcmask 1043459   ;;  %v361_v63 = vld [vmem:[#allocation2] sm:$0xf] }
  0x73   : > { %v367_v0 = vsel %vm366_vm3, %v326_v56, %v319_v55 }
  0x74   : > { %v369_v1 = vsel %vm368_vm4, %v333_v58, %v367_v0 }
  0x75   : > { %v371_v2 = vsel %vm370_vm5, %v340_v59, %v369_v1 }
  0x76   : > { %v373_v3 = vadd.f32 %v371_v2, %v361_v63 }
  0x78   : > { %374 = vst [vmem:[#allocation2] sm:$0xf] %v373_v3 }
  0x79 PF: > { %p534_p8 = scmp.ne.s32.totalorder %s774_s15, 3 }
  0x7b   : > { %378 = sbr.rel (%p534_p8) target bundleno = 251 (0xfb), region = 48 }
  0x80   : > { %v379_v4 = vld [vmem:[#allocation2] sm:$0xf]  ;;  %vm380_vm6 = vcmask 1043456   ;;  %v386_v6 = vlaneseq  ;;  %vm390_vm7 = vcmask 24576  }
  0x81   : > { %v381_v5 = vsel %vm380_vm6, %v379_v4, 0.0 }
  0x82   : > { %382 = vadd.xlane.f32.xlu0 %v381_v5  ;;  %v387_v7 = vand.u32 127, %v386_v6 }
  0xf5   : > { %v383_v8 = vpop.xlane.xlu0 %382 }
  0xf6   : > { %v384_v9 = vmul.f32 0.00012207031, %v383_v8 }
  0xf8   : > { %v388_v10 = vperm.slane %v384_v9, %v387_v7 }
  0xfa   : > { %391 = vst.msk [vmem:[%s985_s28] sm:$0x1] %vm390_vm7, %v388_v10 }
  0xfb PF: > { %s401_s15 = scalar_lea.hbm %s1047_s2, %s778_s16  ;;  %s403_s24 = sshll.u32 %s985_s28, 4  ;;  %s404_s24 = int_to_ptr.vmem [resolvable:$true] %s403_s24 }
  0xfc   : > { %s405_s17 = sshll.u32 %s401_s15, 4  ;;  %s393_s22 = scalar_lea.sflag [#allocation5], %s275_s7  ;;  %s406_s17 = int_to_ptr.hbm [resolvable:$true] %s405_s17 }
  0xfd   : > { %s678_s23 = sshra.s32 %s406_s17, 4  ;;  %s684_s8 = scalar_lea.hbm %s1047_s2, 2  ;;  %s679_s23 = int_to_ptr.hbm [resolvable:$true] %s678_s23 }
  0xfe   : > { %s680_s21 = scalar_lea.hbm %s679_s23, 1  ;;  %p685_p13 = scmp.lt.s32.totalorder %s679_s23, %s1047_s2 }
  0xff   : > { %p681_p9 = scmp.ne.s32.totalorder %s679_s23, %s680_s21  ;;  %p686_p0 = scmp.lt.s32.totalorder %s684_s8, %s680_s21 }
 0x101   : > { %p682_p10 = pnand %p681_p9, %p901_p12  ;;  %p687_p2 = por %p686_p0, %p685_p13 }
 0x103   : > { %p683_p11 = pneg %p682_p10 }
 0x105   : > { %p688_p4 = pnand %p687_p2, %p683_p11 }
 0x107   : > { %691 = shalt.err (!%p688_p4)
}
 0x108   : > { %557 = dma.vmem_to_hbm [thread:$0]  (%p901_p12), %s404_s24, 16, %s406_s17, %s393_s22  }
 0x109 PF: > { %p563_p5 = scmp.ge.s32.totalorder %s790_s19, 2  ;;  %s417_s16 = sand.u32 1, %s750_s9  }
 0x10a   : > { %s418_s27 = scalar_lea.sflag [#allocation5], %s417_s16 }
 0x10b   : > { %p560_p6 = pnand %p563_p5, %p913_p1 }
 0x10d   : > { %p561_p3 = pneg %p560_p6 }
 0x10f   : > { %745 = dma.done.wait (%p561_p3), %s418_s27, 16  }
 0x110   : > { %747 = vsyncadd (%p561_p3), %s418_s27, 4294967280  ;;  %s21_s19 = sadd.s32 1, %s790_s19   ;;  %s1064_s15 = sld [smem:[#allocation18_spill]] }
 0x111   : > { %p18_p7 = scmp.ge.s32.totalorder %s21_s19, 10   ;;  %s1065_s16 = sld [smem:[#allocation19_spill]] }
 0x112   : > { %s1066_s17 = sld [smem:[#allocation20_spill]]  ;;  %s1068_s9 = smov %s754_s10 }
 0x113   : > { %s1067_s18 = sld [smem:[#allocation21_spill]]  ;;  %s1069_s10 = smov %s758_s11 }
 0x114   : > { %s1070_s11 = smov %s906_s4  ;;  %s1071_s12 = smov %s766_s13 }
 0x115   : > { %s1072_s13 = smov %s770_s14  ;;  %s1073_s14 = smov %s909_s5 }
 0x116   :  { %20 = sbr.rel (!%p18_p7) target bundleno = 13 (0xd), region = 108 }
 0x11b   :  { %423 = vsyncpa [#allocation4], 1 }
 0x11c   :  { %425 = vsyncpa [#allocation4 + $0x1], 1 }
 0x11d   :  { %426 = vsyncpa [#allocation7], 1 }
 0x11e   :  { %428 = vsyncpa [#allocation7 + $0x1], 1 }
 0x11f   :  { %429 = vsyncpa [#allocation5], 1 }
 0x120   :  { %431 = vsyncpa [#allocation5 + $0x1], 1 }

</bundles_post_ra>
